<compile_context>
chip_gen: v5e
topology: v5e:2x2
jax: 0.10.0
libtpu: 0.0.40
codegen_flags: <defaults>
</compile_context>

<pallas_src>
import math

import jax
import jax.numpy as jnp
from jax.experimental import pallas as pl
from jax.experimental.pallas import tpu as pltpu

_LANE = 128        # vreg lane width
_SUBLANE = 8       # f32 sublane count
_MAX_TILE_N = 4096  # upper bound on rows per grid step


def _round_up(x: int, m: int) -> int:
    return ((x + m - 1) // m) * m


def _footprint(rows: int, cols: int, itemsize: int = 4) -> int:
    """VMEM bytes of a (rows, cols) buffer after (8,128) layout padding."""
    return _round_up(max(rows, 1), _SUBLANE) * _round_up(max(cols, 1), _LANE) * itemsize


def _pick_tile_n(n: int, ft_in: int, ft_mid: int, ft_out: int, max_tile_n: int) -> int:
    """Rows per grid step.

    Large enough to amortize per-step Pallas overhead, small enough that the
    streamed (double-buffered) buffers stay well inside v5e's 16 MiB scoped
    VMEM default, and — when more than one step is needed — an even number of
    balanced steps so the "parallel" row axis shards cleanly across v7x's two
    TensorCores.
    """
    per_row = (2 * _round_up(ft_in, _LANE)       # x tile, double-buffered
               + 2 * _round_up(ft_out, _LANE)    # out tile, double-buffered
               + _round_up(ft_mid, _LANE)        # in-kernel hidden activation
               ) * 4
    budget = 8 << 20                             # conservative streamed-buffer budget
    cap = min(max_tile_n, max(_SUBLANE, (budget // per_row) // _SUBLANE * _SUBLANE))
    if n <= cap:
        return n                                 # one full-extent row block (no 8-row rule)
    steps = 2
    while True:
        tile = _round_up(pl.cdiv(n, steps), _SUBLANE)
        if tile <= cap:
            return tile
        steps += 2


def _projection_kernel(x_ref, w1_ref, b1_ref, w2_ref, b2_ref, o_ref):
    # x_ref: (TILE_N, ft_in); w1_ref: (ft_in, ft_mid); b1_ref: (1, ft_mid)
    # w2_ref: (ft_mid, ft_out); b2_ref: (1, ft_out); o_ref: (TILE_N, ft_out)
    h = jnp.dot(x_ref[...], w1_ref[...], preferred_element_type=jnp.float32)
    h = h + b1_ref[...]
    h = jnp.where(h > 0, h, jnp.exp(h) - 1.0)            # ELU(alpha=1); exp goes to EUP
    out = jnp.dot(h.astype(w2_ref.dtype), w2_ref[...],
                  preferred_element_type=jnp.float32) + b2_ref[...]
    o_ref[...] = out.astype(o_ref.dtype)


def grace_projection(z, fc1_w, fc1_b, fc2_w, fc2_b, *,
                     compute_dtype=None, max_tile_n: int = _MAX_TILE_N):
    """GRACE.projection: fc2(ELU(fc1(z))).

    z: (N, num_hidden) f32;
    fc1_w: (num_proj_hidden, num_hidden), fc1_b: (num_proj_hidden,)  (PyTorch layout)
    fc2_w: (num_hidden, num_proj_hidden), fc2_b: (num_hidden,)
    compute_dtype: optionally jnp.bfloat16 to halve the dominant x HBM read and
    run the MXU at native bf16 rate (accumulation stays f32).
    Returns (N, num_hidden) in z.dtype.
    """
    n, ft_in = z.shape
    ft_mid, ft_in_w = fc1_w.shape
    ft_out, ft_mid_w = fc2_w.shape
    assert ft_in_w == ft_in and ft_mid_w == ft_mid
    assert fc1_b.shape == (ft_mid,) and fc2_b.shape == (ft_out,)

    cdt = jnp.dtype(compute_dtype) if compute_dtype is not None else z.dtype
    # No padding / copying of the activation matrix.  Only the tiny weights get
    # a transpose so the kernel contracts along their leading dim; biases are
    # reshaped to (1, dim) for broadcast.
    x = z.astype(cdt)
    w1 = fc1_w.T.astype(cdt)                        # (ft_in, ft_mid)
    w2 = fc2_w.T.astype(cdt)                        # (ft_mid, ft_out)
    b1 = fc1_b.reshape(1, ft_mid).astype(jnp.float32)
    b2 = fc2_b.reshape(1, ft_out).astype(jnp.float32)

    tile_n = _pick_tile_n(n, ft_in, ft_mid, ft_out, max_tile_n)
    grid = (pl.cdiv(n, tile_n),)

    itemsize = jnp.dtype(cdt).itemsize
    out_itemsize = jnp.dtype(z.dtype).itemsize

    # Exact (8,128)-padded VMEM need plus ~2 MiB headroom for compiler scratch.
    vmem_limit = (2 * _footprint(tile_n, ft_in, itemsize)      # x tiles (double-buffered)
                  + 2 * _footprint(tile_n, ft_out, out_itemsize)  # out tiles (double-buffered)
                  + 2 * _footprint(ft_in, ft_mid, itemsize)    # w1 (resident)
                  + 2 * _footprint(ft_mid, ft_out, itemsize)   # w2 (resident)
                  + 2 * _footprint(1, ft_mid, 4)               # b1
                  + 2 * _footprint(1, ft_out, 4)               # b2
                  + _footprint(tile_n, ft_mid, 4)              # in-kernel hidden activation
                  + (2 << 20))

    cost = pl.CostEstimate(
        flops=2 * n * ft_in * ft_mid + 2 * n * ft_mid * ft_out,
        transcendentals=n * ft_mid,                            # ELU exp
        bytes_accessed=((n * ft_in + ft_in * ft_mid + ft_mid * ft_out) * itemsize
                        + (ft_mid + ft_out) * 4
                        + n * ft_out * out_itemsize),
    )

    out = pl.pallas_call(
        _projection_kernel,
        out_shape=jax.ShapeDtypeStruct((n, ft_out), z.dtype),
        grid_spec=pl.GridSpec(
            grid=grid,
            in_specs=[
                pl.BlockSpec((tile_n, ft_in), lambda i: (i, 0)),    # x: streamed per step
                pl.BlockSpec((ft_in, ft_mid), lambda i: (0, 0)),    # w1: VMEM-resident
                pl.BlockSpec((1, ft_mid), lambda i: (0, 0)),        # b1: VMEM-resident
                pl.BlockSpec((ft_mid, ft_out), lambda i: (0, 0)),   # w2: VMEM-resident
                pl.BlockSpec((1, ft_out), lambda i: (0, 0)),        # b2: VMEM-resident
            ],
            out_specs=pl.BlockSpec((tile_n, ft_out), lambda i: (i, 0)),
        ),
        compiler_params=pltpu.CompilerParams(
            dimension_semantics=("parallel",),   # independent row tiles -> 2 TCs on v7x
            vmem_limit_bytes=int(vmem_limit),
        ),
        cost_estimate=cost,
    )(x, w1, b1, w2, b2)

    return out


def init_linear_params(key, in_features, out_features):
    """Matches torch.nn.Linear default init (kaiming_uniform(a=sqrt(5)) + uniform bias)."""
    k_w, k_b = jax.random.split(key)
    bound = 1.0 / math.sqrt(in_features)
    weight = jax.random.uniform(k_w, (out_features, in_features),
                                minval=-bound, maxval=bound, dtype=jnp.float32)
    bias = jax.random.uniform(k_b, (out_features,),
                              minval=-bound, maxval=bound, dtype=jnp.float32)
    return weight, bias


if __name__ == "__main__":
    key = jax.random.PRNGKey(0)
    k_z, k_fc1, k_fc2 = jax.random.split(key, 3)

    N, NUM_HIDDEN, NUM_PROJ_HIDDEN = 16, 32, 64
    z = jax.random.normal(k_z, (N, NUM_HIDDEN), dtype=jnp.float32)
    fc1_w, fc1_b = init_linear_params(k_fc1, NUM_HIDDEN, NUM_PROJ_HIDDEN)
    fc2_w, fc2_b = init_linear_params(k_fc2, NUM_PROJ_HIDDEN, NUM_HIDDEN)

    def reference(zz):
        h = zz @ fc1_w.T + fc1_b
        h = jnp.where(h > 0, h, jnp.exp(h) - 1.0)
        return h @ fc2_w.T + fc2_b

    # 1) Single-step path: one full-extent row block, zero padding anywhere.
    out = grace_projection(z, fc1_w, fc1_b, fc2_w, fc2_b)
    jax.block_until_ready(out)
    assert out.shape == (N, NUM_HIDDEN)
    assert jnp.allclose(out, reference(z), atol=1e-4, rtol=1e-4)

    # 2) Multi-step path with a ragged last block (exercises the cdiv grid and
    #    masked edge loads/stores the production path uses for large N).
    N2 = 20
    z2 = jax.random.normal(k_z, (N2, NUM_HIDDEN), dtype=jnp.float32)
    out2 = grace_projection(z2, fc1_w, fc1_b, fc2_w, fc2_b, max_tile_n=8)
    jax.block_until_ready(out2)
    assert out2.shape == (N2, NUM_HIDDEN)
    assert jnp.allclose(out2, reference(z2), atol=1e-4, rtol=1e-4)

    print("KERNEL_OK")
</pallas_src>

<mosaic_0001>
module attributes {stable_mosaic.version = 11 : i64} {
  func.func @_projection_kernel(%arg0: i32, %arg1: memref<16x32xf32, #tpu.memory_space<vmem>>, %arg2: memref<32x64xf32, #tpu.memory_space<vmem>>, %arg3: memref<1x64xf32, #tpu.memory_space<vmem>>, %arg4: memref<64x32xf32, #tpu.memory_space<vmem>>, %arg5: memref<1x32xf32, #tpu.memory_space<vmem>>, %arg6: memref<16x32xf32, #tpu.memory_space<vmem>>) attributes {dimension_semantics = [#tpu.dimension_semantics<parallel>], iteration_bounds = array<i64: 1>, scalar_prefetch = 0 : i64, scratch_operands = 0 : i64, tpu.core_type = #tpu.core_type<tc>, window_params = [{transform_indices = @transform_0, window_bounds = array<i64: 16, 32>}, {pipeline_mode = #tpu.pipeline_mode<synchronous>, transform_indices = @transform_1, window_bounds = array<i64: 32, 64>}, {pipeline_mode = #tpu.pipeline_mode<synchronous>, transform_indices = @transform_2, window_bounds = array<i64: 1, 64>}, {pipeline_mode = #tpu.pipeline_mode<synchronous>, transform_indices = @transform_3, window_bounds = array<i64: 64, 32>}, {pipeline_mode = #tpu.pipeline_mode<synchronous>, transform_indices = @transform_4, window_bounds = array<i64: 1, 32>}, {transform_indices = @transform_5, window_bounds = array<i64: 16, 32>}]} {
    %c0 = arith.constant 0 : index
    %c0_0 = arith.constant 0 : index
    %0 = vector.load %arg1[%c0, %c0_0] : memref<16x32xf32, #tpu.memory_space<vmem>>, vector<16x32xf32>
    %c0_1 = arith.constant 0 : index
    %c0_2 = arith.constant 0 : index
    %1 = vector.load %arg2[%c0_1, %c0_2] : memref<32x64xf32, #tpu.memory_space<vmem>>, vector<32x64xf32>
    %cst = arith.constant dense<0.000000e+00> : vector<16x64xf32>
    %2 = tpu.matmul %0, %1, %cst {dimension_numbers = #tpu.dot_dimension_numbers<[1], [0], [0], [1], [0, 0, 1, 1], [], []>} : vector<16x32xf32>, vector<32x64xf32>, vector<16x64xf32> -> vector<16x64xf32>
    %c0_3 = arith.constant 0 : index
    %c0_4 = arith.constant 0 : index
    %3 = vector.load %arg3[%c0_3, %c0_4] : memref<1x64xf32, #tpu.memory_space<vmem>>, vector<1x64xf32>
    %4 = vector.broadcast %3 : vector<1x64xf32> to vector<16x64xf32>
    %5 = arith.addf %2, %4 : vector<16x64xf32>
    %cst_5 = arith.constant 0.000000e+00 : f32
    %6 = vector.broadcast %cst_5 : f32 to vector<16x64xf32>
    %7 = arith.cmpf ogt, %5, %6 : vector<16x64xf32>
    %8 = math.exp %5 : vector<16x64xf32>
    %cst_6 = arith.constant 1.000000e+00 : f32
    %9 = vector.broadcast %cst_6 : f32 to vector<16x64xf32>
    %10 = arith.subf %8, %9 : vector<16x64xf32>
    %11 = arith.select %7, %5, %10 : vector<16x64xi1>, vector<16x64xf32>
    %c0_7 = arith.constant 0 : index
    %c0_8 = arith.constant 0 : index
    %12 = vector.load %arg4[%c0_7, %c0_8] : memref<64x32xf32, #tpu.memory_space<vmem>>, vector<64x32xf32>
    %cst_9 = arith.constant dense<0.000000e+00> : vector<16x32xf32>
    %13 = tpu.matmul %11, %12, %cst_9 {dimension_numbers = #tpu.dot_dimension_numbers<[1], [0], [0], [1], [0, 0, 1, 1], [], []>} : vector<16x64xf32>, vector<64x32xf32>, vector<16x32xf32> -> vector<16x32xf32>
    %c0_10 = arith.constant 0 : index
    %c0_11 = arith.constant 0 : index
    %14 = vector.load %arg5[%c0_10, %c0_11] : memref<1x32xf32, #tpu.memory_space<vmem>>, vector<1x32xf32>
    %15 = vector.broadcast %14 : vector<1x32xf32> to vector<16x32xf32>
    %16 = arith.addf %13, %15 : vector<16x32xf32>
    %c0_12 = arith.constant 0 : index
    %c0_13 = arith.constant 0 : index
    %17 = vector.load %arg6[%c0_12, %c0_13] : memref<16x32xf32, #tpu.memory_space<vmem>>, vector<16x32xf32>
    tpu.vector_store %arg6[%c0_12, %c0_13], %16 {strides = array<i32>} : memref<16x32xf32, #tpu.memory_space<vmem>>, vector<16x32xf32>,
    return
  }
  func.func @transform_0(%arg0: i32) -> (i32, i32) {
    %c0_i32 = arith.constant 0 : i32
    %c0_i32_0 = arith.constant 0 : i32
    return %arg0, %c0_i32 : i32, i32
  }
  func.func @transform_1(%arg0: i32) -> (i32, i32) {
    %c0_i32 = arith.constant 0 : i32
    %c0_i32_0 = arith.constant 0 : i32
    %c0_i32_1 = arith.constant 0 : i32
    return %c0_i32, %c0_i32_0 : i32, i32
  }
  func.func @transform_2(%arg0: i32) -> (i32, i32) {
    %c0_i32 = arith.constant 0 : i32
    %c0_i32_0 = arith.constant 0 : i32
    %c0_i32_1 = arith.constant 0 : i32
    return %c0_i32, %c0_i32_0 : i32, i32
  }
  func.func @transform_3(%arg0: i32) -> (i32, i32) {
    %c0_i32 = arith.constant 0 : i32
    %c0_i32_0 = arith.constant 0 : i32
    %c0_i32_1 = arith.constant 0 : i32
    return %c0_i32, %c0_i32_0 : i32, i32
  }
  func.func @transform_4(%arg0: i32) -> (i32, i32) {
    %c0_i32 = arith.constant 0 : i32
    %c0_i32_0 = arith.constant 0 : i32
    %c0_i32_1 = arith.constant 0 : i32
    return %c0_i32, %c0_i32_0 : i32, i32
  }
  func.func @transform_5(%arg0: i32) -> (i32, i32) {
    %c0_i32 = arith.constant 0 : i32
    %c0_i32_0 = arith.constant 0 : i32
    return %arg0, %c0_i32 : i32, i32
  }
}

</mosaic_0001>

<bundles_post_ra>
// kernel: tpu_custom_call.1
= control target key start
LH: loop header
LB: loop body
LE: loop exit
PB: predicated region body
PF: predicated region fallthrough
CT: control target
= control target key end

     0   :  { %s274_s0 = inlined_call_operand.vmem [shape: f32[16,32], index: 0, kind: input, shape index: {}]   ;;  %s275_s1 = inlined_call_operand.vmem [shape: f32[32,64], index: 1, kind: input, shape index: {}]   ;;  %s276_s2 = inlined_call_operand.vmem [shape: f32[1,64], index: 2, kind: input, shape index: {}]   ;;  %s277_s3 = inlined_call_operand.vmem [shape: f32[64,32], index: 3, kind: input, shape index: {}]   ;;  %s278_s4 = inlined_call_operand.vmem [shape: f32[1,32], index: 4, kind: input, shape index: {}]   ;;  %s279_s5 = inlined_call_operand.hbm [shape: f32[16,32], index: 5, kind: output, shape index: {}]  }
   0x1   :  { %v26_v0 = vld [vmem:[%s275_s1 + $0x18] sm:$0xff]  ;;  %v25_v1 = vld [vmem:[%s275_s1 + $0x10] sm:$0xff]  ;;  %v24_v2 = vld [vmem:[%s275_s1 + $0x8] sm:$0xff] }
   0x2   :  { %139 = vmatpush.msra.mxu3 %v26_v0  ;;  %50 = vmatpush.msra.mxu0 %v26_v0 }
   0x4   :  { %140 = vmatpush.msra.mxu3 %v25_v1  ;;  %51 = vmatpush.msra.mxu0 %v25_v1 }
   0x5   :  { %10 = vsyncpa [#allocation3], 0  ;;  %v23_v3 = vld [vmem:[%s275_s1] sm:$0xff]  ;;  %v22_v4 = vld [vmem:[%s274_s0 + $0x8] sm:$0xff]  ;;  %vm31_vm0 = vcmask 261120   ;;  %vm83_vm2 = vcmask 523264  }
   0x6   :  { %141 = vmatpush.msra.mxu3 %v24_v2  ;;  %52 = vmatpush.msra.mxu0 %v24_v2  ;;  %v21_v5 = vld [vmem:[%s274_s0] sm:$0xff]  ;;  %v78_v6 = vld [vmem:[%s277_s3 + $0x38] sm:$0xff]  ;;  %v77_v7 = vld [vmem:[%s277_s3 + $0x30] sm:$0xff]  ;;  %s186_s21 = smov [#allocation2]   ;;  %s121_s25 = sshll.u32 %s279_s5, 4  ;;  %s122_s25 = int_to_ptr.hbm [resolvable:$true] %s121_s25 }
   0x7   :  { %98 = vmatpush.msra.mxu1 %v78_v6  ;;  %143 = vmatpush.msra.mxu2 %v78_v6  ;;  %v76_v8 = vld [vmem:[%s277_s3 + $0x28] sm:$0xff]  ;;  %v75_v9 = vld [vmem:[%s277_s3 + $0x20] sm:$0xff]  ;;  %v74_v10 = vld [vmem:[%s277_s3 + $0x18] sm:$0xff]  ;;  %s119_s22 = sshll.u32 %s186_s21, 4  ;;  %s187_s26 = smov 128   ;;  %s120_s22 = int_to_ptr.vmem [resolvable:$true] %s119_s22 }
   0x8   :  { %142 = vmatpush.msra.mxu3 %v23_v3  ;;  %53 = vmatpush.msra.mxu0 %v23_v3  ;;  %v73_v11 = vld [vmem:[%s277_s3 + $0x10] sm:$0xff]  ;;  %v72_v12 = vld [vmem:[%s277_s3 + $0x8] sm:$0xff]  ;;  %v71_v13 = vld [vmem:[%s277_s3] sm:$0xff]  ;;  %s188_s27 = smov 8  }
   0x9   :  { %134 = vmatmul.msk.f32.vlgmr.msra.gmra.mxu3 %vm31_vm0, %v22_v4  ;;  %133 = vmatmul.msk.f32.vlgmr.msra.gmra.mxu0 %vm31_vm0, %v21_v5  ;;  %v154_v14 = vld [vmem:[%s276_s2] ss:$0 sm:$0xff] }
   0xa   :  { %99 = vmatpush.msra.mxu1 %v77_v7  ;;  %144 = vmatpush.msra.mxu2 %v77_v7  ;;  %v155_v27 = vld [vmem:[%s278_s4] ss:$0 sm:$0xff] }
   0xc   :  { %100 = vmatpush.msra.mxu1 %v76_v8  ;;  %145 = vmatpush.msra.mxu2 %v76_v8 }
   0xe   :  { %101 = vmatpush.msra.mxu1 %v75_v9  ;;  %146 = vmatpush.msra.mxu2 %v75_v9 }
  0x10   :  { %102 = vmatpush.msra.mxu1 %v74_v10  ;;  %147 = vmatpush.msra.mxu2 %v74_v10 }
  0x12   :  { %103 = vmatpush.msra.mxu1 %v73_v11  ;;  %148 = vmatpush.msra.mxu2 %v73_v11 }
  0x14   :  { %104 = vmatpush.msra.mxu1 %v72_v12  ;;  %149 = vmatpush.msra.mxu2 %v72_v12 }
  0x16   :  { %105 = vmatpush.msra.mxu1 %v71_v13  ;;  %150 = vmatpush.msra.mxu2 %v71_v13 }
  0x86   :  { %v55_v15 = vpop.f32.mrf.mxu0 }
  0x87   :  { %v56_v16 = vadd.f32 %v154_v14, %v55_v15 }
  0x89   :  { %v63_v17 = vmul.f32 1.442695, %v56_v16  ;;  %vm61_vm1 = vcmp.gt.f32.partialorder %v56_v16, 0.0 }
  0x8b   :  { %156 = vpow2.f32 %v63_v17 }
  0x8c   :  { %v58_v18 = vpop.f32.mrf.mxu3 }
  0x8d   :  { %v59_v19 = vadd.f32 %v154_v14, %v58_v18 }
  0x8f   :  { %v65_v20 = vmul.f32 1.442695, %v59_v19  ;;  %vm62_vm3 = vcmp.gt.f32.partialorder %v59_v19, 0.0 }
  0x91   :  { %v157_v21 = vpop.eup %156  ;;  %158 = vpow2.f32 %v65_v20 }
  0x92   :  { %v135_v22 = vadd.f32 -1.0, %v157_v21 }
  0x94   :  { %v69_v23 = vsel %vm61_vm1, %v56_v16, %v135_v22 }
  0x95   :  { %137 = vmatmul.msk.f32.vlgmr.msra.gmra.mxu1 %vm83_vm2, %v69_v23 }
  0x97   :  { %v159_v24 = vpop.eup %158 }
  0x98   :  { %v136_v25 = vadd.f32 -1.0, %v159_v24 }
  0x9a   :  { %v70_v26 = vsel %vm62_vm3, %v59_v19, %v136_v25 }
  0x9b   :  { %138 = vmatmul.msk.f32.vlgmr.msra.gmra.mxu2 %vm83_vm2, %v70_v26 }
 0x112   :  { %v107_v28 = vpop.f32.mrf.mxu1 }
 0x113   :  { %v108_v29 = vadd.f32 %v155_v27, %v107_v28 }
 0x115   :  { %113 = vst.msk [vmem:[#allocation2] sm:$0xff] %vm31_vm0, %v108_v29 }
 0x11e   :  { %v110_v30 = vpop.f32.mrf.mxu2 }
 0x11f   :  { %v111_v31 = vadd.f32 %v155_v27, %v110_v30 }
 0x121   :  { %114 = vst.msk [vmem:[#allocation2 + $0x8] sm:$0xff] %vm31_vm0, %v111_v31 }
 0x122   :  { %127 = dma.vmem_to_hbm [thread:$0]  %s120_s22, 256, %s122_s25, [#allocation3], %s187_s26, %s187_s26, %s188_s27  }
 0x123   :  { %184 = dma.done.wait [#allocation3], 256  }
 0x124   :  { %185 = vsyncadd [#allocation3], 4294967040 }
 0x125   :  { %132 = vsyncpa [#allocation3], 1 }

</bundles_post_ra>
